<compile_context>
chip_gen: v7x
topology: tpu7x:2x2x1
jax: 0.10.0
libtpu: 0.0.40
codegen_flags: <defaults>
</compile_context>

<pallas_src>
import jax
import jax.numpy as jnp
from jax import lax
from jax.experimental import pallas as pl
from jax.experimental.pallas import tpu as pltpu

LANE = 128
SUBLANE = 8
VMEM_LIMIT_BYTES = 32 * 1024 * 1024  # conservative: fits v5e/v6e scoped + v7x physical


def _round_up(x, m):
    return (x + m - 1) // m * m


# ----------------------------------------------------------------------------
# Pallas kernel: classifier MLP + cross-entropy partial-sum + hit partial-count
# ----------------------------------------------------------------------------
def classifier_loss_kernel(x_ref, w1_ref, b1_ref, w2_ref, b2_ref, labels_ref, out_ref):
    # x (TB, Dp) bf16, w1 (Dp, Hp) bf16, b1 (1, Hp) f32,
    # w2 (Hp, Cp) bf16, b2 (1, Cp) f32 (padded cols = -1e30), labels (TB, 1) i32.
    x = x_ref[...]

    # Linear(D_in -> H) + ReLU   (bf16 MXU, f32 accumulate)
    h = jnp.dot(x, w1_ref[...], preferred_element_type=jnp.float32) + b1_ref[...]
    h = jnp.maximum(h, 0.0)

    # Linear(H -> C)             (bf16 MXU, f32 accumulate)
    logits = jnp.dot(h.astype(jnp.bfloat16), w2_ref[...],
                     preferred_element_type=jnp.float32) + b2_ref[...]
    tb, cp = logits.shape

    labels = labels_ref[...]                                   # (TB, 1) int32
    valid = labels >= 0                                        # padded rows have -1
    col = lax.broadcasted_iota(jnp.int32, (tb, cp), 1)

    # numerically-stable log-softmax cross-entropy, accumulated as a SUM per tile
    m = jnp.max(logits, axis=-1, keepdims=True)
    lse = m + jnp.log(jnp.sum(jnp.exp(logits - m), axis=-1, keepdims=True))
    true_logit = jnp.sum(jnp.where(col == labels, logits, 0.0), axis=-1, keepdims=True)
    loss_sum = jnp.sum(jnp.where(valid, lse - true_logit, 0.0))

    # hit count: argmax with first-index tie-break (matches jnp.argmax)
    pred = jnp.min(jnp.where(logits == m, col, jnp.int32(cp)), axis=-1, keepdims=True)
    hit = jnp.sum(jnp.where(jnp.logical_and(valid, pred == labels), 1.0, 0.0))

    # single lane-dense partial slab: [0,0] = loss_sum, [0,1] = hit, rest 0
    r = lax.broadcasted_iota(jnp.int32, (SUBLANE, LANE), 0)
    c = lax.broadcasted_iota(jnp.int32, (SUBLANE, LANE), 1)
    tile = jnp.where(jnp.logical_and(r == 0, c == 0), loss_sum,
                     jnp.where(jnp.logical_and(r == 0, c == 1), hit, 0.0))
    out_ref[...] = tile.reshape(1, SUBLANE, LANE)


def finetune_head(user_repr, w1, b1, w2, b2, labels):
    """user_repr (B, D_in) f32, w1 (D_in, H), b1 (H,), w2 (H, C), b2 (C,), labels (B,) int."""
    B, d_in = user_repr.shape
    H = w1.shape[1]
    C = w2.shape[1]
    d_in_p = _round_up(d_in, LANE)
    h_p = _round_up(H, LANE)
    c_p = _round_up(C, LANE)

    # batch tile: up to 512 rows, multiple of 8 sublanes; streaming bytes per tile
    # (2 bufs * TB * (d_in_p*2 + 4)) stay far under the 32 MiB VMEM budget.
    tb = min(512, _round_up(B, SUBLANE))
    b_pad = _round_up(B, tb)
    n_tiles = b_pad // tb

    # pad + cast: bf16 matmul operands, f32 biases, -1e30 padded logit bias, -1 padded labels
    x_p = jnp.zeros((b_pad, d_in_p), jnp.bfloat16).at[:B, :d_in].set(
        user_repr.astype(jnp.bfloat16))
    w1_p = jnp.zeros((d_in_p, h_p), jnp.bfloat16).at[:d_in, :H].set(w1.astype(jnp.bfloat16))
    b1_p = jnp.zeros((1, h_p), jnp.float32).at[0, :H].set(b1.reshape(-1).astype(jnp.float32))
    w2_p = jnp.zeros((h_p, c_p), jnp.bfloat16).at[:H, :C].set(w2.astype(jnp.bfloat16))
    b2_p = jnp.full((1, c_p), -1e30, jnp.float32).at[0, :C].set(
        b2.reshape(-1).astype(jnp.float32))
    labels_p = jnp.full((b_pad, 1), -1, jnp.int32).at[:B, 0].set(
        labels.astype(jnp.int32).reshape(-1))

    const = lambda i: (0, 0)
    partials = pl.pallas_call(
        classifier_loss_kernel,
        out_shape=jax.ShapeDtypeStruct((n_tiles, SUBLANE, LANE), jnp.float32),
        grid=(n_tiles,),
        in_specs=[
            pl.BlockSpec((tb, d_in_p), lambda i: (i, 0)),   # x: streamed per tile
            pl.BlockSpec((d_in_p, h_p), const),             # w1: resident
            pl.BlockSpec((1, h_p), const),                  # b1: resident
            pl.BlockSpec((h_p, c_p), const),                # w2: resident
            pl.BlockSpec((1, c_p), const),                  # b2: resident
            pl.BlockSpec((tb, 1), lambda i: (i, 0)),        # labels: streamed per tile
        ],
        out_specs=pl.BlockSpec((1, SUBLANE, LANE), lambda i: (i, 0, 0)),
        compiler_params=pltpu.CompilerParams(
            dimension_semantics=("parallel",),
            vmem_limit_bytes=VMEM_LIMIT_BYTES,
        ),
    )(x_p, w1_p, b1_p, w2_p, b2_p, labels_p)

    # tiny finalize in JAX: global mean over the TRUE batch size + global hit sum
    loss = jnp.sum(partials[:, 0, 0]) / jnp.float32(B)
    hit = jnp.sum(partials[:, 0, 1])
    return loss, hit


# ----------------------------------------------------------------------------
# Deterministic parameter construction (mirrors _init_weights: N(0, 0.02), zero bias)
# ----------------------------------------------------------------------------
def make_params(key, n_items, emb_dim, num_pooling, n_labels):
    k_emb, k_w1, k_w2 = jax.random.split(key, 3)
    d_in = emb_dim * num_pooling
    return {
        "item_emb": 0.02 * jax.random.normal(k_emb, (n_items, emb_dim), jnp.float32),
        "w1": 0.02 * jax.random.normal(k_w1, (d_in, emb_dim), jnp.float32),
        "b1": jnp.zeros((emb_dim,), jnp.float32),
        "w2": 0.02 * jax.random.normal(k_w2, (emb_dim, n_labels), jnp.float32),
        "b2": jnp.zeros((n_labels,), jnp.float32),
    }


def base_model_get_ur(params, item_seq):
    # TODO(synk): the real base_model (args.base_model / pretrain_method) is not provided;
    # this deterministic embedding + mean/max pooling stand-in produces the documented
    # (B, emb_dim * num_pooling) user representation. Once the real get_ur is known, this
    # gather+pool stage should be fused into the same pallas_call via scalar-prefetched
    # item_seq + DMA gather to avoid materializing user_repr in HBM.
    emb = params["item_emb"][item_seq]            # (B, S, emb_dim)
    mean_pool = jnp.mean(emb, axis=1)
    max_pool = jnp.max(emb, axis=1)
    user_repr = jnp.concatenate([mean_pool, max_pool], axis=-1)   # num_pooling = 2
    reg_loss = None
    return user_repr, reg_loss


def finetune_forward(params, item_seq, labels, reg_coef=0.0):
    user_repr, reg_loss = base_model_get_ur(params, item_seq)
    batch_loss, batch_hit = finetune_head(
        user_repr, params["w1"], params["b1"], params["w2"], params["b2"], labels)
    if reg_loss is not None:
        batch_loss = batch_loss + reg_coef * reg_loss
    return batch_loss, batch_hit


# ----------------------------------------------------------------------------
if __name__ == "__main__":
    key = jax.random.PRNGKey(0)
    B, S = 8, 8                 # batch, sequence length
    n_items = 100
    emb_dim = 32
    num_pooling = 2
    n_labels = 10

    k_p, k_seq, k_lab = jax.random.split(key, 3)
    params = make_params(k_p, n_items, emb_dim, num_pooling, n_labels)
    item_seq = jax.random.randint(k_seq, (B, S), 0, n_items, dtype=jnp.int32)
    labels = jax.random.randint(k_lab, (B,), 0, n_labels, dtype=jnp.int32)

    loss, hit = finetune_forward(params, item_seq, labels)
    loss = jax.block_until_ready(loss)
    hit = jax.block_until_ready(hit)

    # pure-JAX reference with the SAME bf16 matmul operand precision (f32 accumulate)
    user_repr, _ = base_model_get_ur(params, item_seq)
    xb = user_repr.astype(jnp.bfloat16)
    h_ref = jnp.dot(xb, params["w1"].astype(jnp.bfloat16),
                    preferred_element_type=jnp.float32) + params["b1"]
    h_ref = jnp.maximum(h_ref, 0.0)
    logits_ref = jnp.dot(h_ref.astype(jnp.bfloat16), params["w2"].astype(jnp.bfloat16),
                         preferred_element_type=jnp.float32) + params["b2"]
    lse_ref = jax.nn.logsumexp(logits_ref, axis=-1)
    ref_loss = jnp.mean(lse_ref - logits_ref[jnp.arange(B), labels])
    ref_hit = jnp.sum((jnp.argmax(logits_ref, axis=-1) == labels).astype(jnp.float32))

    assert jnp.allclose(loss, ref_loss, atol=1e-4, rtol=1e-4), (loss, ref_loss)
    assert int(hit) == int(ref_hit), (hit, ref_hit)

    print("KERNEL_OK")
</pallas_src>

<mosaic_0001>
module attributes {stable_mosaic.version = 11 : i64} {
  func.func @classifier_loss_kernel(%arg0: i32, %arg1: memref<8x128xbf16, #tpu.memory_space<vmem>>, %arg2: memref<128x128xbf16, #tpu.memory_space<vmem>>, %arg3: memref<1x128xf32, #tpu.memory_space<vmem>>, %arg4: memref<128x128xbf16, #tpu.memory_space<vmem>>, %arg5: memref<1x128xf32, #tpu.memory_space<vmem>>, %arg6: memref<8x1xi32, #tpu.memory_space<vmem>>, %arg7: memref<1x8x128xf32, #tpu.memory_space<vmem>>) attributes {dimension_semantics = [#tpu.dimension_semantics<parallel>], iteration_bounds = array<i64: 1>, scalar_prefetch = 0 : i64, scratch_operands = 0 : i64, tpu.core_type = #tpu.core_type<tc>, window_params = [{transform_indices = @transform_0, window_bounds = array<i64: 8, 128>}, {pipeline_mode = #tpu.pipeline_mode<synchronous>, transform_indices = @transform_1, window_bounds = array<i64: 128, 128>}, {pipeline_mode = #tpu.pipeline_mode<synchronous>, transform_indices = @transform_2, window_bounds = array<i64: 1, 128>}, {pipeline_mode = #tpu.pipeline_mode<synchronous>, transform_indices = @transform_3, window_bounds = array<i64: 128, 128>}, {pipeline_mode = #tpu.pipeline_mode<synchronous>, transform_indices = @transform_4, window_bounds = array<i64: 1, 128>}, {transform_indices = @transform_5, window_bounds = array<i64: 8, 1>}, {transform_indices = @transform_6, window_bounds = array<i64: 1, 8, 128>}]} {
    %c0 = arith.constant 0 : index
    %c0_0 = arith.constant 0 : index
    %0 = vector.load %arg1[%c0, %c0_0] : memref<8x128xbf16, #tpu.memory_space<vmem>>, vector<8x128xbf16>
    %c0_1 = arith.constant 0 : index
    %c0_2 = arith.constant 0 : index
    %1 = vector.load %arg2[%c0_1, %c0_2] : memref<128x128xbf16, #tpu.memory_space<vmem>>, vector<128x128xbf16>
    %cst = arith.constant dense<0.000000e+00> : vector<8x128xf32>
    %2 = tpu.matmul %0, %1, %cst {dimension_numbers = #tpu.dot_dimension_numbers<[1], [0], [0], [1], [0, 0, 1, 1], [], []>} : vector<8x128xbf16>, vector<128x128xbf16>, vector<8x128xf32> -> vector<8x128xf32>
    %c0_3 = arith.constant 0 : index
    %c0_4 = arith.constant 0 : index
    %3 = vector.load %arg3[%c0_3, %c0_4] : memref<1x128xf32, #tpu.memory_space<vmem>>, vector<1x128xf32>
    %4 = vector.broadcast %3 : vector<1x128xf32> to vector<8x128xf32>
    %5 = arith.addf %2, %4 : vector<8x128xf32>
    %cst_5 = arith.constant 0.000000e+00 : f32
    %6 = vector.broadcast %cst_5 : f32 to vector<8x128xf32>
    %7 = arith.maximumf %5, %6 : vector<8x128xf32>
    %8 = arith.truncf %7 : vector<8x128xf32> to vector<8x128xbf16>
    %c0_6 = arith.constant 0 : index
    %c0_7 = arith.constant 0 : index
    %9 = vector.load %arg4[%c0_6, %c0_7] : memref<128x128xbf16, #tpu.memory_space<vmem>>, vector<128x128xbf16>
    %cst_8 = arith.constant dense<0.000000e+00> : vector<8x128xf32>
    %10 = tpu.matmul %8, %9, %cst_8 {dimension_numbers = #tpu.dot_dimension_numbers<[1], [0], [0], [1], [0, 0, 1, 1], [], []>} : vector<8x128xbf16>, vector<128x128xbf16>, vector<8x128xf32> -> vector<8x128xf32>
    %c0_9 = arith.constant 0 : index
    %c0_10 = arith.constant 0 : index
    %11 = vector.load %arg5[%c0_9, %c0_10] : memref<1x128xf32, #tpu.memory_space<vmem>>, vector<1x128xf32>
    %12 = vector.broadcast %11 : vector<1x128xf32> to vector<8x128xf32>
    %13 = arith.addf %10, %12 : vector<8x128xf32>
    %c0_11 = arith.constant 0 : index
    %c0_12 = arith.constant 0 : index
    %14 = vector.load %arg6[%c0_11, %c0_12] : memref<8x1xi32, #tpu.memory_space<vmem>>, vector<8x1xi32>
    %c0_i32 = arith.constant 0 : i32
    %15 = vector.broadcast %c0_i32 : i32 to vector<8x1xi32>
    %16 = arith.cmpi sge, %14, %15 : vector<8x1xi32>
    %17 = tpu.iota {dimensions = array<i32: 1>} : vector<8x128xi32>
    %cst_13 = arith.constant dense<0xFF800000> : vector<8xf32>
    %18 = vector.multi_reduction <maximumf>, %13, %cst_13 [1] : vector<8x128xf32> to vector<8xf32>
    %19 = vector.shape_cast %18 : vector<8xf32> to vector<8x1xf32>
    %20 = vector.broadcast %19 : vector<8x1xf32> to vector<8x128xf32>
    %21 = arith.subf %13, %20 : vector<8x128xf32>
    %22 = math.exp %21 : vector<8x128xf32>
    %cst_14 = arith.constant dense<0.000000e+00> : vector<8xf32>
    %23 = vector.multi_reduction <add>, %22, %cst_14 [1] : vector<8x128xf32> to vector<8xf32>
    %24 = vector.shape_cast %23 : vector<8xf32> to vector<8x1xf32>
    %25 = math.log %24 : vector<8x1xf32>
    %26 = arith.addf %19, %25 : vector<8x1xf32>
    %27 = vector.broadcast %14 : vector<8x1xi32> to vector<8x128xi32>
    %28 = arith.cmpi eq, %17, %27 : vector<8x128xi32>
    %cst_15 = arith.constant 0.000000e+00 : f32
    %29 = vector.broadcast %cst_15 : f32 to vector<8x128xf32>
    %30 = arith.select %28, %13, %29 : vector<8x128xi1>, vector<8x128xf32>
    %cst_16 = arith.constant dense<0.000000e+00> : vector<8xf32>
    %31 = vector.multi_reduction <add>, %30, %cst_16 [1] : vector<8x128xf32> to vector<8xf32>
    %32 = vector.shape_cast %31 : vector<8xf32> to vector<8x1xf32>
    %33 = arith.subf %26, %32 : vector<8x1xf32>
    %cst_17 = arith.constant 0.000000e+00 : f32
    %34 = vector.broadcast %cst_17 : f32 to vector<8x1xf32>
    %35 = arith.select %16, %33, %34 : vector<8x1xi1>, vector<8x1xf32>
    %36 = vector.shape_cast %35 : vector<8x1xf32> to vector<1x8x1xf32>
    %cst_18 = arith.constant dense<0.000000e+00> : vector<1xf32>
    %37 = vector.multi_reduction <add>, %36, %cst_18 [1, 2] : vector<1x8x1xf32> to vector<1xf32>
    %38 = vector.shape_cast %37 : vector<1xf32> to vector<1x1x1xf32>
    %39 = vector.extract %38[0, 0, 0] : f32 from vector<1x1x1xf32>
    %40 = vector.broadcast %19 : vector<8x1xf32> to vector<8x128xf32>
    %41 = arith.cmpf oeq, %13, %40 : vector<8x128xf32>
    %c128_i32 = arith.constant 128 : i32
    %42 = vector.broadcast %c128_i32 : i32 to vector<8x128xi32>
    %43 = arith.select %41, %17, %42 : vector<8x128xi1>, vector<8x128xi32>
    %cst_19 = arith.constant dense<2147483647> : vector<8xi32>
    %44 = vector.multi_reduction <minsi>, %43, %cst_19 [1] : vector<8x128xi32> to vector<8xi32>
    %45 = vector.shape_cast %44 : vector<8xi32> to vector<8x1xi32>
    %46 = arith.cmpi eq, %45, %14 : vector<8x1xi32>
    %47 = arith.andi %16, %46 : vector<8x1xi1>
    %cst_20 = arith.constant 1.000000e+00 : f32
    %cst_21 = arith.constant 0.000000e+00 : f32
    %48 = vector.broadcast %cst_20 : f32 to vector<8x1xf32>
    %49 = vector.broadcast %cst_21 : f32 to vector<8x1xf32>
    %50 = arith.select %47, %48, %49 : vector<8x1xi1>, vector<8x1xf32>
    %51 = vector.shape_cast %50 : vector<8x1xf32> to vector<1x8x1xf32>
    %cst_22 = arith.constant dense<0.000000e+00> : vector<1xf32>
    %52 = vector.multi_reduction <add>, %51, %cst_22 [1, 2] : vector<1x8x1xf32> to vector<1xf32>
    %53 = vector.shape_cast %52 : vector<1xf32> to vector<1x1x1xf32>
    %54 = vector.extract %53[0, 0, 0] : f32 from vector<1x1x1xf32>
    %55 = tpu.iota {dimensions = array<i32: 0>} : vector<8x128xi32>
    %56 = tpu.iota {dimensions = array<i32: 1>} : vector<8x128xi32>
    %c0_i32_23 = arith.constant 0 : i32
    %57 = vector.broadcast %c0_i32_23 : i32 to vector<8x128xi32>
    %58 = arith.cmpi eq, %55, %57 : vector<8x128xi32>
    %c0_i32_24 = arith.constant 0 : i32
    %59 = vector.broadcast %c0_i32_24 : i32 to vector<8x128xi32>
    %60 = arith.cmpi eq, %56, %59 : vector<8x128xi32>
    %61 = arith.andi %58, %60 : vector<8x128xi1>
    %c0_i32_25 = arith.constant 0 : i32
    %62 = vector.broadcast %c0_i32_25 : i32 to vector<8x128xi32>
    %63 = arith.cmpi eq, %55, %62 : vector<8x128xi32>
    %c1_i32 = arith.constant 1 : i32
    %64 = vector.broadcast %c1_i32 : i32 to vector<8x128xi32>
    %65 = arith.cmpi eq, %56, %64 : vector<8x128xi32>
    %66 = arith.andi %63, %65 : vector<8x128xi1>
    %cst_26 = arith.constant 0.000000e+00 : f32
    %67 = vector.broadcast %54 : f32 to vector<8x128xf32>
    %68 = vector.broadcast %cst_26 : f32 to vector<8x128xf32>
    %69 = arith.select %66, %67, %68 : vector<8x128xi1>, vector<8x128xf32>
    %70 = vector.broadcast %39 : f32 to vector<8x128xf32>
    %71 = arith.select %61, %70, %69 : vector<8x128xi1>, vector<8x128xf32>
    %72 = vector.shape_cast %71 : vector<8x128xf32> to vector<1x8x128xf32>
    %c0_27 = arith.constant 0 : index
    %c0_28 = arith.constant 0 : index
    %c0_29 = arith.constant 0 : index
    %73 = vector.load %arg7[%c0_27, %c0_28, %c0_29] : memref<1x8x128xf32, #tpu.memory_space<vmem>>, vector<1x8x128xf32>
    tpu.vector_store %arg7[%c0_27, %c0_28, %c0_29], %72 {strides = array<i32>} : memref<1x8x128xf32, #tpu.memory_space<vmem>>, vector<1x8x128xf32>,
    return
  }
  func.func @transform_0(%arg0: i32) -> (i32, i32) {
    %c0_i32 = arith.constant 0 : i32
    %c0_i32_0 = arith.constant 0 : i32
    return %arg0, %c0_i32 : i32, i32
  }
  func.func @transform_1(%arg0: i32) -> (i32, i32) {
    %c0_i32 = arith.constant 0 : i32
    %c0_i32_0 = arith.constant 0 : i32
    %c0_i32_1 = arith.constant 0 : i32
    return %c0_i32, %c0_i32_0 : i32, i32
  }
  func.func @transform_2(%arg0: i32) -> (i32, i32) {
    %c0_i32 = arith.constant 0 : i32
    %c0_i32_0 = arith.constant 0 : i32
    %c0_i32_1 = arith.constant 0 : i32
    return %c0_i32, %c0_i32_0 : i32, i32
  }
  func.func @transform_3(%arg0: i32) -> (i32, i32) {
    %c0_i32 = arith.constant 0 : i32
    %c0_i32_0 = arith.constant 0 : i32
    %c0_i32_1 = arith.constant 0 : i32
    return %c0_i32, %c0_i32_0 : i32, i32
  }
  func.func @transform_4(%arg0: i32) -> (i32, i32) {
    %c0_i32 = arith.constant 0 : i32
    %c0_i32_0 = arith.constant 0 : i32
    %c0_i32_1 = arith.constant 0 : i32
    return %c0_i32, %c0_i32_0 : i32, i32
  }
  func.func @transform_5(%arg0: i32) -> (i32, i32) {
    %c0_i32 = arith.constant 0 : i32
    %c0_i32_0 = arith.constant 0 : i32
    return %arg0, %c0_i32 : i32, i32
  }
  func.func @transform_6(%arg0: i32) -> (i32, i32, i32) {
    %c0_i32 = arith.constant 0 : i32
    %c0_i32_0 = arith.constant 0 : i32
    %c0_i32_1 = arith.constant 0 : i32
    return %arg0, %c0_i32, %c0_i32_0 : i32, i32, i32
  }
}

</mosaic_0001>

<bundles_post_ra>
// kernel: tpu_custom_call.1
= control target key start
LH: loop header
LB: loop body
LE: loop exit
PB: predicated region body
PF: predicated region fallthrough
CT: control target
= control target key end

     0   :  { %11 = vsyncpa [#allocation3], 0  ;;  %s667_s0 = inlined_call_operand.vmem [shape: bf16[8,128], index: 0, kind: input, shape index: {}]   ;;  %s668_s1 = inlined_call_operand.hbm [shape: bf16[128,128], index: 1, kind: input, shape index: {}]   ;;  %s669_s2 = inlined_call_operand.vmem [shape: f32[1,128], index: 2, kind: input, shape index: {}]   ;;  %s670_s3 = inlined_call_operand.hbm [shape: bf16[128,128], index: 3, kind: input, shape index: {}]   ;;  %s671_s4 = inlined_call_operand.vmem [shape: f32[1,128], index: 4, kind: input, shape index: {}]   ;;  %s672_s5 = inlined_call_operand.vmem [shape: s32[8,1], index: 5, kind: input, shape index: {}]   ;;  %s673_s6 = inlined_call_operand.hbm [shape: f32[1,8,128], index: 6, kind: output, shape index: {}]  }
   0x1   :  { %12 = vsyncpa [#allocation6], 0 }
   0x2   :  { %13 = vsyncpa [#allocation4], 0  ;;  %s551_s21 = smov [#allocation2]   ;;  %s479_s25 = scalar_lea.hbm %s668_s1, 1024 }
   0x3   :  { %s21_s22 = sshll.u32 %s551_s21, 4  ;;  %p480_p0 = scmp.ne.s32.totalorder %s668_s1, %s479_s25  ;;  %s22_s22 = int_to_ptr.vmem [resolvable:$true] %s21_s22 }
   0x4   :  { %p483_p1 = scmp.lt.u32.totalorder %s479_s25, %s668_s1 }
   0x6   :  { %p485_p2 = pnand %p483_p1, %p480_p0 }
   0x8   :  { %488 = shalt.err (!%p485_p2)
}
   0x9   :  { %s489_s30 = scalar_lea.vmem %s22_s22, 1024  ;;  %p494_p4 = scmp.lt.s32.totalorder %s22_s22, %s22_s22 }
   0xa   :  { %p490_p3 = scmp.ne.s32.totalorder %s22_s22, %s489_s30  ;;  %p495_p5 = scmp.lt.s32.totalorder %s489_s30, %s489_s30 }
   0xc   :  { %p496_p6 = por %p495_p5, %p494_p4 }
   0xe   :  { %p497_p7 = pnand %p496_p6, %p490_p3 }
  0x10   :  { %500 = shalt.err (!%p497_p7)
}
  0x11   :  { %s552_s7 = smov 64   ;;  %s553_s8 = smov 4  }
  0x12   :  { %27 = dma.hbm_to_vmem [thread:$0]  %s668_s1, 1024, %s22_s22, [#allocation3], %s552_s7, %s552_s7, %s553_s8  }
  0x13   :  { %s554_s11 = smov [#allocation5]   ;;  %s501_s15 = scalar_lea.hbm %s670_s3, 1024 }
  0x14   :  { %s35_s12 = sshll.u32 %s554_s11, 4  ;;  %p502_p8 = scmp.ne.s32.totalorder %s670_s3, %s501_s15  ;;  %s36_s12 = int_to_ptr.vmem [resolvable:$true] %s35_s12 }
  0x15   :  { %p505_p9 = scmp.lt.u32.totalorder %s501_s15, %s670_s3 }
  0x17   :  { %p507_p10 = pnand %p505_p9, %p502_p8 }
  0x19   :  { %510 = shalt.err (!%p507_p10)
}
  0x1a   :  { %s511_s20 = scalar_lea.vmem %s36_s12, 1024  ;;  %p516_p12 = scmp.lt.s32.totalorder %s36_s12, %s36_s12 }
  0x1b   :  { %p512_p11 = scmp.ne.s32.totalorder %s36_s12, %s511_s20  ;;  %p517_p13 = scmp.lt.s32.totalorder %s511_s20, %s511_s20 }
  0x1d   :  { %p518_p0 = por %p517_p13, %p516_p12 }
  0x1f   :  { %p519_p1 = pnand %p518_p0, %p512_p11 }
  0x21   :  { %522 = shalt.err (!%p519_p1)
}
  0x22   :  { %41 = dma.hbm_to_vmem [thread:$0]  %s670_s3, 1024, %s36_s12, [#allocation6], %s552_s7, %s552_s7, %s553_s8  }
  0x23   :  { %545 = dma.done.wait [#allocation3], 1024  }
  0x24   :  { %546 = vsyncadd [#allocation3], 4294966272 }
  0x25   :  { %547 = dma.done.wait [#allocation6], 1024  }
  0x26   :  { %548 = vsyncadd [#allocation6], 4294966272  ;;  %v555_v0 = vmov 0.0   ;;  %vm556_vm0 = vmmov 0   ;;  %v459_v1 = vld [vmem:[#allocation2] sm:$0xff]   ;;  %v460_v2 = vld [vmem:[#allocation2 + $0x8] sm:$0xff]   ;;  %v280_v34 = vlaneseq }
  0x27   :  { %405 = vmatprep.subr.bf16.mxu0 %v555_v0  ;;  %421 = vmatprep.mubr.msk.bf16.mxu0 %vm556_vm0, %v555_v0  ;;  %v461_v3 = vld [vmem:[#allocation2 + $0x10] sm:$0xff]   ;;  %v467_v4 = vld [vmem:[#allocation5] sm:$0xff]   ;;  %v462_v5 = vld [vmem:[#allocation2 + $0x18] sm:$0xff]   ;;  %v557_v19 = vmov 0   ;;  %vm301_vm5 = vcmask 7168  }
  0x28   :  { %425 = vmatprep.subr.bf16.mxu1 %v555_v0  ;;  %441 = vmatprep.mubr.msk.bf16.mxu1 %vm556_vm0, %v555_v0  ;;  %v468_v6 = vld [vmem:[#allocation5 + $0x8] sm:$0xff]   ;;  %v463_v7 = vld [vmem:[#allocation2 + $0x20] sm:$0xff]   ;;  %v469_v8 = vld [vmem:[#allocation5 + $0x10] sm:$0xff]   ;;  %v648_v35 = vand.u32 127, %v280_v34 }
  0x29   :  { %406 = vmatpush3.bf16.msra.mxu0 %v459_v1  ;;  %426 = vmatpush3.bf16.msra.mxu1 %v467_v4  ;;  %v464_v9 = vld [vmem:[#allocation2 + $0x28] sm:$0xff]   ;;  %v470_v10 = vld [vmem:[#allocation5 + $0x18] sm:$0xff]   ;;  %v465_v11 = vld [vmem:[#allocation2 + $0x30] sm:$0xff]  }
  0x2a   :  { %407 = vmatprep.subr.bf16.mxu0 %v555_v0  ;;  %427 = vmatprep.subr.bf16.mxu1 %v555_v0  ;;  %v471_v12 = vld [vmem:[#allocation5 + $0x20] sm:$0xff]   ;;  %v466_v13 = vld [vmem:[#allocation2 + $0x38] sm:$0xff]   ;;  %v472_v14 = vld [vmem:[#allocation5 + $0x28] sm:$0xff]   ;;  %vm346_vm9 = vcmp.eq.s32.totalorder %v648_v35, 1  ;;  %vm344_vm10 = vcmp.eq.s32.totalorder %v648_v35, 0 }
  0x2b   :  { %v53_v15 = vld [vmem:[%s667_s0] sm:$0xf]  ;;  %v473_v16 = vld [vmem:[#allocation5 + $0x30] sm:$0xff]   ;;  %v474_v17 = vld [vmem:[#allocation5 + $0x38] sm:$0xff]   ;;  %457 = vset.pattern.permute.xlu1 %v557_v19  ;;  %458 = vset.pattern.permute.xlu0 %v557_v19 }
  0x2c   :  { %v278_v18 = vld [vmem:[%s672_s5] sm:$0xff] }
  0x2d   :  { %408 = vmatpush3.bf16.msra.mxu0 %v460_v2  ;;  %428 = vmatpush3.bf16.msra.mxu1 %v468_v6  ;;  %v369_v20 = vld [vmem:[%s669_s2] ss:$0 sm:$0xff]  ;;  %vm279_vm4 = vcmp.ge.s32.totalorder %v278_v18, 0 }
  0x2e   :  { %409 = vmatprep.subr.bf16.mxu0 %v555_v0  ;;  %429 = vmatprep.subr.bf16.mxu1 %v555_v0  ;;  %v378_v28 = vld [vmem:[%s671_s4] ss:$0 sm:$0xff]  ;;  %s558_s4 = smov [#allocation7]  }
  0x2f   :  { %293 = vperm.xlu1 %457, %v278_v18   ;;  %s359_s5 = sshll.u32 %s558_s4, 4  ;;  %s360_s5 = int_to_ptr.vmem [resolvable:$true] %s359_s5 }
  0x30   :  { %s523_s29 = scalar_lea.vmem %s360_s5, 128  ;;  %p528_p3 = scmp.lt.s32.totalorder %s360_s5, %s360_s5 }
  0x31   :  { %410 = vmatpush3.bf16.msra.mxu0 %v461_v3  ;;  %430 = vmatpush3.bf16.msra.mxu1 %v469_v8  ;;  %p524_p2 = scmp.ne.s32.totalorder %s360_s5, %s523_s29  ;;  %p529_p4 = scmp.lt.s32.totalorder %s523_s29, %s523_s29 }
  0x32   :  { %411 = vmatprep.subr.bf16.mxu0 %v555_v0  ;;  %431 = vmatprep.subr.bf16.mxu1 %v555_v0 }
  0x33   :  { %p530_p5 = por %p529_p4, %p528_p3 }
  0x35   :  { %412 = vmatpush3.bf16.msra.mxu0 %v462_v5  ;;  %432 = vmatpush3.bf16.msra.mxu1 %v470_v10  ;;  %p531_p6 = pnand %p530_p5, %p524_p2 }
  0x36   :  { %413 = vmatprep.subr.bf16.mxu0 %v555_v0  ;;  %433 = vmatprep.subr.bf16.mxu1 %v555_v0 }
  0x39   :  { %414 = vmatpush3.bf16.msra.mxu0 %v463_v7  ;;  %434 = vmatpush3.bf16.msra.mxu1 %v471_v12 }
  0x3a   :  { %415 = vmatprep.subr.bf16.mxu0 %v555_v0  ;;  %435 = vmatprep.subr.bf16.mxu1 %v555_v0 }
  0x3d   :  { %416 = vmatpush3.bf16.msra.mxu0 %v464_v9  ;;  %436 = vmatpush3.bf16.msra.mxu1 %v472_v14 }
  0x3e   :  { %417 = vmatprep.subr.bf16.mxu0 %v555_v0  ;;  %437 = vmatprep.subr.bf16.mxu1 %v555_v0 }
  0x41   :  { %418 = vmatpush3.bf16.msra.mxu0 %v465_v11  ;;  %438 = vmatpush3.bf16.msra.mxu1 %v473_v16 }
  0x42   :  { %419 = vmatprep.subr.bf16.mxu0 %v555_v0  ;;  %439 = vmatprep.subr.bf16.mxu1 %v555_v0 }
  0x45   :  { %420 = vmatpush3.bf16.msra.mxu0 %v466_v13  ;;  %440 = vmatpush3.bf16.msra.mxu1 %v474_v17 }
  0x48   :  { %422 = vmatmul.mubr.bf16.vlgmr.msra.gmra.mrb[0].mxu0 %v53_v15  ;;  %v342_v15 = vshrl.u32 %v280_v34, 7 }
  0x4a   :  { %vm343_vm8 = vcmp.eq.s32.totalorder %v342_v15, 0 }
  0x4b   :  { %vm347_vm11 = vmand %vm343_vm8, %vm346_vm9 }
  0x4c   :  { %vm345_vm12 = vmand %vm343_vm8, %vm344_vm10 }
  0xae   :  { %v294_v44 = vpop.permute.xlu1 %293 }
  0xaf   :  { %vm295_vm3 = vcmp.eq.s32.totalorder %v648_v35, %v294_v44 }
 0x11b   :  { %v159_v21 = vpop.f32.mrb[0].mxu0 }
 0x11c   :  { %v160_v22 = vadd.f32 %v369_v20, %v159_v21  ;;  %v423_v23 = vpop.f32.mrb[1].mxu0 }
 0x11d   :  { %v162_v24 = vpop.f32.mrb[2].mxu0 }
 0x11e   :  { %v165_v25 = vmax.f32 %v160_v22, 0.0  ;;  %v424_v26 = vpop.f32.mrb[3].mxu0 }
 0x120   :  { %v166_v27 = vpack.c.bf16 %v165_v25, %v165_v25 }
 0x122   :  { %442 = vmatmul.mubr.bf16.vlgmr.msra.gmra.mrb[0].mxu1 %v166_v27 }
 0x1f5   :  { %v272_v29 = vpop.f32.mrb[0].mxu1 }
 0x1f6   :  { %v273_v30 = vadd.f32 %v378_v28, %v272_v29  ;;  %v443_v31 = vpop.f32.mrb[1].mxu1 }
 0x1f7   :  { %v275_v32 = vpop.f32.mrb[2].mxu1 }
 0x1f8   :  { %282 = vmax.xlane.f32.xlu0 %v273_v30  ;;  %v444_v33 = vpop.f32.mrb[3].mxu1  ;;  %v296_v48 = vsel %vm295_vm3, %v273_v30, 0.0 }
 0x285   :  { %v283_v36 = vpop.xlane.xlu0 %282 }
 0x286   :  { %v284_v37 = vsub.f32 %v273_v30, %v283_v36  ;;  %vm312_vm1 = vcmp.eq.f32.partialorder %v273_v30, %v283_v36 }
 0x287   :  { %v313_v38 = vsel %vm312_vm1, %v648_v35, 128 }
 0x288   :  { %v285_v39 = vmul.f32 1.442695, %v284_v37  ;;  %v315_v40 = vshra.s32 %v313_v38, 16  ;;  %v314_v43 = vand.u32 65535, %v313_v38 }
 0x28a   :  { %475 = vpow2.f32 %v285_v39  ;;  %v317_v41 = vcvt.s32.f32 %v315_v40  ;;  %v316_v46 = vcvt.s32.f32 %v314_v43 }
 0x28c   :  { %318 = vmin.xlane.f32.xlu0 %v317_v41 }
 0x294   :  { %v476_v42 = vpop.eup %475 }
 0x295   :  { %287 = vadd.xlane.f32.xlu1 %v476_v42 }
 0x319   :  { %v319_v45 = vpop.xlane.xlu0 %318 }
 0x31a   :  { %vm320_vm2 = vcmp.eq.f32.partialorder %v317_v41, %v319_v45  ;;  %v325_v51 = vcvt.f32.s32 %v319_v45 }
 0x31b   :  { %v321_v47 = vsel %vm320_vm2, %v316_v46, inf }
 0x31c   :  { %322 = vmin.xlane.f32.xlu0 %v321_v47  ;;  %v326_v54 = vshll.u32 %v325_v51, 16 }
 0x320   :  { %297 = vadd.xlane.f32.xlu0 %v296_v48 }
 0x322   :  { %v288_v49 = vpop.xlane.xlu1 %287 }
 0x323   :  { %477 = vlog2.f32 %v288_v49 }
 0x32d   :  { %v478_v50 = vpop.eup %477 }
 0x32e   :  { %v290_v52 = vmul.f32 0.6931472, %v478_v50 }
 0x330   :  { %v291_v57 = vadd.f32 %v290_v52, %v283_v36 }
 0x3a9   :  { %v323_v53 = vpop.xlane.xlu0 %322 }
 0x3aa   :  { %v324_v55 = vcvt.f32.s32 %v323_v53 }
 0x3ac   :  { %v327_v56 = vadd.s32 %v326_v54, %v324_v55 }
 0x3ad   :  { %v298_v58 = vpop.xlane.xlu0 %297 }
 0x3ae   :  { %v299_v59 = vsub.f32 %v291_v57, %v298_v58  ;;  %vm328_vm6 = vcmp.eq.s32.totalorder %v327_v56, %v278_v18 }
 0x3af   :  { %vm329_vm7 = vmand %vm279_vm4, %vm328_vm6 }
 0x3b0   :  { %v300_v60 = vsel %vm279_vm4, %v299_v59, 0.0  ;;  %v330_v62 = vsel %vm329_vm7, 1.0, %v555_v0 }
 0x3b1   :  { %v302_v61 = vsel %vm301_vm5, %v300_v60, 0.0  ;;  %v331_v63 = vsel %vm301_vm5, %v330_v62, 0.0 }
 0x3b2   :  { %303 = vadd.xlane.f32.xlu0 %v302_v61 }
 0x3b6   :  { %332 = vadd.xlane.f32.xlu0 %v331_v63 }
 0x43f   :  { %v304_v1 = vpop.xlane.xlu0 %303 }
 0x440   :  { %v305_v2 = vrot.slane %v304_v1, 4 }
 0x442   :  { %v306_v3 = vadd.f32 %v305_v2, %v304_v1 }
 0x443   :  { %v333_v4 = vpop.xlane.xlu0 %332 }
 0x444   :  { %v307_v5 = vrot.slane %v306_v3, 2  ;;  %v334_v6 = vrot.slane %v333_v4, 4 }
 0x446   :  { %v335_v7 = vadd.f32 %v334_v6, %v333_v4  ;;  %v308_v8 = vadd.f32 %v307_v5, %v306_v3 }
 0x448   :  { %v336_v9 = vrot.slane %v335_v7, 2  ;;  %v309_v10 = vrot.slane %v308_v8, 1 }
 0x44a   :  { %v337_v11 = vadd.f32 %v336_v9, %v335_v7  ;;  %v310_v12 = vadd.f32 %v309_v10, %v308_v8 }
 0x44c   :  { %445 = vpush %v310_v12  ;;  %v338_v13 = vrot.slane %v337_v11, 1 }
 0x44e   :  { %v339_v14 = vadd.f32 %v338_v13, %v337_v11 }
 0x450   :  { %447 = vpush %v339_v14 }
 0x47d   :  { %s446_s2 = spop %445 }
 0x47e   :  { %v350_v16 = vstv %s446_s2 }
 0x481   :  { %s448_s28 = spop %447 }
 0x482   :  { %v348_v0 = vstv %s448_s28 }
 0x483   :  { %v349_v17 = vsel %vm347_vm11, %v348_v0, 0.0 }
 0x484   :  { %v351_v18 = vsel %vm345_vm12, %v350_v16, %v349_v17 }
 0x485   :  { %352 = vst [vmem:[#allocation7] sm:$0xff] %v351_v18 }
 0x486   :  { %534 = shalt.err (!%p531_p6)
}
 0x487   :  { %s535_s8 = scalar_lea.hbm %s673_s6, 128 }
 0x488   :  { %p536_p7 = scmp.ne.s32.totalorder %s673_s6, %s535_s8  ;;  %p539_p8 = scmp.lt.u32.totalorder %s535_s8, %s673_s6 }
 0x48a   :  { %p541_p9 = pnand %p539_p8, %p536_p7 }
 0x48c   :  { %544 = shalt.err (!%p541_p9)
}
 0x48d   :  { %362 = dma.vmem_to_hbm [thread:$0]  %s360_s5, 128, %s673_s6, [#allocation4]  }
 0x48e   :  { %549 = dma.done.wait [#allocation4], 128  }
 0x48f   :  { %550 = vsyncadd [#allocation4], 4294967168 }
 0x490   :  { %366 = vsyncpa [#allocation3], 1 }
 0x491   :  { %367 = vsyncpa [#allocation6], 1 }
 0x492   :  { %368 = vsyncpa [#allocation4], 1 }

</bundles_post_ra>
